<compile_context>
chip_gen: v5e
topology: v5e:2x2
jax: 0.10.0
libtpu: 0.0.40
codegen_flags: <defaults>
</compile_context>

<pallas_src>
import jax
import jax.numpy as jnp
from jax.experimental import pallas as pl
from jax.experimental.pallas import tpu as pltpu

D_IN, D_H1, D_H2, D_OUT = 1056, 256, 64, 6
D_OUT_PAD = 128            # lane-dense output width
TM_MAX = 1024              # max batch rows per grid step

_HI = jax.lax.Precision.HIGHEST


def cls_lt_fused_kernel(x_ref, w_ref, b_ref, o_ref):
    # Single affine map on the MXU: y = x @ W_fused + b_fused (f32 accumulate).
    o_ref[...] = (
        jnp.dot(x_ref[...], w_ref[...], preferred_element_type=jnp.float32)
        + b_ref[...]
    ).astype(o_ref.dtype)


def fuse_params(params):
    """One-time fold of the three Linears into one affine map, padded to 128 lanes.

    Call this at parameter-load time (NOT per forward call)."""
    w1, b1 = params["w1"], params["b1"]
    w2, b2 = params["w2"], params["b2"]
    w3, b3 = params["w3"], params["b3"]
    w_fused = jnp.dot(jnp.dot(w1, w2, precision=_HI), w3, precision=_HI)      # (D_IN, 6)
    b_fused = (jnp.dot(jnp.dot(b1, w2, precision=_HI), w3, precision=_HI)
               + jnp.dot(b2, w3, precision=_HI) + b3)                          # (1, 6)
    w_pad = jnp.zeros((D_IN, D_OUT_PAD), jnp.float32).at[:, :D_OUT].set(w_fused)
    b_pad = jnp.zeros((1, D_OUT_PAD), jnp.float32).at[:, :D_OUT].set(b_fused)
    return w_pad, b_pad


def _pick_tm(batch):
    # Smallest sublane-aligned (multiple-of-8) tile covering the batch, capped
    # at TM_MAX: no wasted rows at small B, few grid steps at large B.
    return min(TM_MAX, ((batch + 7) // 8) * 8)


def cls_lt_forward(x, w_pad, b_pad):
    """x: (B, 1056) float32, fused params from fuse_params(). Returns (B, 6) f32."""
    B = x.shape[0]
    tm = _pick_tm(B)
    n_tiles = pl.cdiv(B, tm)   # ragged last tile handled by Pallas, no jnp.pad copy

    cost = pl.CostEstimate(
        flops=2 * B * D_IN * D_OUT_PAD,
        transcendentals=0,
        bytes_accessed=(B * D_IN * 4 + D_IN * D_OUT_PAD * 4 + B * D_OUT_PAD * 4),
    )

    out_padded = pl.pallas_call(
        cls_lt_fused_kernel,
        out_shape=jax.ShapeDtypeStruct((B, D_OUT_PAD), jnp.float32),
        grid=(n_tiles,),
        in_specs=[
            # x: streamed, tiled over batch (double-buffered by default).
            pl.BlockSpec((tm, D_IN), lambda i: (i, 0)),
            # fused W / b: VMEM-resident, constant index_map => single buffer.
            pl.BlockSpec((D_IN, D_OUT_PAD), lambda i: (0, 0),
                         pipeline_mode=pl.Buffered(1)),
            pl.BlockSpec((1, D_OUT_PAD), lambda i: (0, 0),
                         pipeline_mode=pl.Buffered(1)),
        ],
        out_specs=pl.BlockSpec((tm, D_OUT_PAD), lambda i: (i, 0)),
        compiler_params=pltpu.CompilerParams(
            dimension_semantics=("parallel",),  # shard batch tiles across v7x's 2 TCs
            vmem_limit_bytes=32 << 20,          # ~11 MB actually used at TM=1024
        ),
        cost_estimate=cost,
    )(x, w_pad, b_pad)

    # TODO(synk): if the downstream consumer tolerates the padded (B,128)
    # layout (or bf16 activations per the perf review), skip this slice.
    return out_padded[:, :D_OUT]


def init_params(key):
    """Deterministic init mimicking torch.nn.Linear (uniform +-1/sqrt(fan_in)).
    Weights stored already transposed to (in, out)."""
    keys = jax.random.split(key, 6)

    def linear(kw, kb, fan_in, fan_out):
        bound = 1.0 / jnp.sqrt(jnp.float32(fan_in))
        w = jax.random.uniform(kw, (fan_in, fan_out), jnp.float32, -bound, bound)
        b = jax.random.uniform(kb, (1, fan_out), jnp.float32, -bound, bound)
        return w, b

    w1, b1 = linear(keys[0], keys[1], D_IN, D_H1)
    w2, b2 = linear(keys[2], keys[3], D_H1, D_H2)
    w3, b3 = linear(keys[4], keys[5], D_H2, D_OUT)
    return {"w1": w1, "b1": b1, "w2": w2, "b2": b2, "w3": w3, "b3": b3}


def reference(x, p):
    # Un-fused three-layer chain, matching the PyTorch module exactly
    # (full-f32 precision so XLA does not downgrade the f32 dots to bf16).
    h1 = jnp.dot(x, p["w1"], precision=_HI) + p["b1"]
    h2 = jnp.dot(h1, p["w2"], precision=_HI) + p["b2"]
    return jnp.dot(h2, p["w3"], precision=_HI) + p["b3"]


if __name__ == "__main__":
    key = jax.random.PRNGKey(0)
    k_x, k_p = jax.random.split(key)
    B = 8
    x = jax.random.normal(k_x, (B, D_IN), jnp.float32)
    params = init_params(k_p)

    # Parameter fusion happens once, at load time (hoisted out of the forward).
    w_pad, b_pad = jax.block_until_ready(fuse_params(params))

    out = jax.block_until_ready(cls_lt_forward(x, w_pad, b_pad))
    ref = reference(x, params)

    assert out.shape == (B, D_OUT)
    assert jnp.allclose(out, ref, atol=1e-4, rtol=1e-3)
    print("KERNEL_OK")
</pallas_src>

<mosaic_0001>
module attributes {stable_mosaic.version = 11 : i64} {
  func.func @cls_lt_fused_kernel(%arg0: i32, %arg1: memref<8x1056xf32, #tpu.memory_space<vmem>>, %arg2: memref<1056x128xf32, #tpu.memory_space<vmem>>, %arg3: memref<1x128xf32, #tpu.memory_space<vmem>>, %arg4: memref<8x128xf32, #tpu.memory_space<vmem>>) attributes {dimension_semantics = [#tpu.dimension_semantics<parallel>], iteration_bounds = array<i64: 1>, scalar_prefetch = 0 : i64, scratch_operands = 0 : i64, tpu.core_type = #tpu.core_type<tc>, window_params = [{transform_indices = @transform_0, window_bounds = array<i64: 8, 1056>}, {pipeline_mode = #tpu.pipeline_mode<synchronous>, transform_indices = @transform_1, window_bounds = array<i64: 1056, 128>}, {pipeline_mode = #tpu.pipeline_mode<synchronous>, transform_indices = @transform_2, window_bounds = array<i64: 1, 128>}, {transform_indices = @transform_3, window_bounds = array<i64: 8, 128>}]} {
    %c0 = arith.constant 0 : index
    %c0_0 = arith.constant 0 : index
    %0 = vector.load %arg1[%c0, %c0_0] : memref<8x1056xf32, #tpu.memory_space<vmem>>, vector<8x1056xf32>
    %c0_1 = arith.constant 0 : index
    %c0_2 = arith.constant 0 : index
    %1 = vector.load %arg2[%c0_1, %c0_2] : memref<1056x128xf32, #tpu.memory_space<vmem>>, vector<1056x128xf32>
    %cst = arith.constant dense<0.000000e+00> : vector<8x128xf32>
    %2 = tpu.matmul %0, %1, %cst {dimension_numbers = #tpu.dot_dimension_numbers<[1], [0], [0], [1], [0, 0, 1, 1], [], []>} : vector<8x1056xf32>, vector<1056x128xf32>, vector<8x128xf32> -> vector<8x128xf32>
    %c0_3 = arith.constant 0 : index
    %c0_4 = arith.constant 0 : index
    %3 = vector.load %arg3[%c0_3, %c0_4] : memref<1x128xf32, #tpu.memory_space<vmem>>, vector<1x128xf32>
    %4 = vector.broadcast %3 : vector<1x128xf32> to vector<8x128xf32>
    %5 = arith.addf %2, %4 : vector<8x128xf32>
    %c0_5 = arith.constant 0 : index
    %c0_6 = arith.constant 0 : index
    %6 = vector.load %arg4[%c0_5, %c0_6] : memref<8x128xf32, #tpu.memory_space<vmem>>, vector<8x128xf32>
    tpu.vector_store %arg4[%c0_5, %c0_6], %5 {strides = array<i32>} : memref<8x128xf32, #tpu.memory_space<vmem>>, vector<8x128xf32>,
    return
  }
  func.func @transform_0(%arg0: i32) -> (i32, i32) {
    %c0_i32 = arith.constant 0 : i32
    %c0_i32_0 = arith.constant 0 : i32
    return %arg0, %c0_i32 : i32, i32
  }
  func.func @transform_1(%arg0: i32) -> (i32, i32) {
    %c0_i32 = arith.constant 0 : i32
    %c0_i32_0 = arith.constant 0 : i32
    %c0_i32_1 = arith.constant 0 : i32
    return %c0_i32, %c0_i32_0 : i32, i32
  }
  func.func @transform_2(%arg0: i32) -> (i32, i32) {
    %c0_i32 = arith.constant 0 : i32
    %c0_i32_0 = arith.constant 0 : i32
    %c0_i32_1 = arith.constant 0 : i32
    return %c0_i32, %c0_i32_0 : i32, i32
  }
  func.func @transform_3(%arg0: i32) -> (i32, i32) {
    %c0_i32 = arith.constant 0 : i32
    %c0_i32_0 = arith.constant 0 : i32
    return %arg0, %c0_i32 : i32, i32
  }
}

</mosaic_0001>

<bundles_post_ra>
// kernel: tpu_custom_call.1
= control target key start
LH: loop header
LB: loop body
LE: loop exit
PB: predicated region body
PF: predicated region fallthrough
CT: control target
= control target key end

     0   :  { %8 = vsyncpa [#allocation3], 0  ;;  %s515_s0 = inlined_call_operand.hbm [shape: f32[8,1056], index: 0, kind: input, shape index: {}]   ;;  %s516_s1 = inlined_call_operand.hbm [shape: f32[1056,128], index: 1, kind: input, shape index: {}]   ;;  %s517_s2 = inlined_call_operand.vmem [shape: f32[1,128], index: 2, kind: input, shape index: {}]   ;;  %s518_s3 = inlined_call_operand.hbm [shape: f32[8,128], index: 3, kind: output, shape index: {}]  }
   0x1   :  { %9 = vsyncpa [#allocation6], 0 }
   0x2   :  { %10 = vsyncpa [#allocation4], 0  ;;  %s16_s14 = sshll.u32 %s515_s0, 4  ;;  %s478_s15 = smov [#allocation2]   ;;  %s17_s14 = int_to_ptr.hbm [resolvable:$true] %s16_s14 }
   0x3   :  { %s18_s16 = sshll.u32 %s478_s15, 4  ;;  %s26_s19 = sshll.u32 %s516_s1, 4  ;;  %s19_s16 = int_to_ptr.vmem [resolvable:$true] %s18_s16  ;;  %s27_s19 = int_to_ptr.hbm [resolvable:$true] %s26_s19 }
   0x4   :  { %21 = dma.hbm_to_vmem [thread:$0]  %s17_s14, 1152, %s19_s16, [#allocation3]  }
   0x5   :  { %s479_s20 = smov [#allocation5]   ;;  %s480_s22 = smov 128  }
   0x6   :  { %s28_s21 = sshll.u32 %s479_s20, 4  ;;  %s481_s23 = smov 8   ;;  %s29_s21 = int_to_ptr.vmem [resolvable:$true] %s28_s21 }
   0x7   :  { %34 = dma.hbm_to_vmem [thread:$0]  %s27_s19, 16896, %s29_s21, [#allocation6], %s480_s22, %s480_s22, %s481_s23  }
   0x8   :  { %472 = dma.done.wait [#allocation3], 1152  }
   0x9   :  { %473 = vsyncadd [#allocation3], 4294966144 }
   0xa   :  { %474 = dma.done.wait [#allocation6], 16896  }
   0xb   :  { %475 = vsyncadd [#allocation6], 4294950400  ;;  %v101_v0 = vld [vmem:[#allocation5 + $0x178] sm:$0xff]  ;;  %v100_v2 = vld [vmem:[#allocation5 + $0x170] sm:$0xff]  ;;  %vm190_vm0 = vcmask 261120   ;;  %s482_s24 = smov [#allocation7]  }
   0xc   :  { %v69_v1 = vld [vmem:[#allocation5 + $0x78] sm:$0xff]  ;;  %234 = vmatpush.msra.mxu2 %v101_v0  ;;  %v68_v4 = vld [vmem:[#allocation5 + $0x70] sm:$0xff]  ;;  %v99_v6 = vld [vmem:[#allocation5 + $0x168] sm:$0xff]  ;;  %s380_s25 = sshll.u32 %s482_s24, 4  ;;  %s381_s25 = int_to_ptr.vmem [resolvable:$true] %s380_s25 }
   0xd   :  { %194 = vmatpush.msra.mxu0 %v69_v1  ;;  %v117_v3 = vld [vmem:[#allocation5 + $0x1f8] sm:$0xff]  ;;  %v116_v7 = vld [vmem:[#allocation5 + $0x1f0] sm:$0xff]  ;;  %v67_v8 = vld [vmem:[#allocation5 + $0x68] sm:$0xff] }
   0xe   :  { %v85_v5 = vld [vmem:[#allocation5 + $0xf8] sm:$0xff]  ;;  %254 = vmatpush.msra.mxu3 %v117_v3  ;;  %235 = vmatpush.msra.mxu2 %v100_v2  ;;  %v84_v9 = vld [vmem:[#allocation5 + $0xf0] sm:$0xff]  ;;  %v115_v10 = vld [vmem:[#allocation5 + $0x1e8] sm:$0xff] }
   0xf   :  { %214 = vmatpush.msra.mxu1 %v85_v5  ;;  %195 = vmatpush.msra.mxu0 %v68_v4  ;;  %v98_v11 = vld [vmem:[#allocation5 + $0x160] sm:$0xff]  ;;  %v83_v13 = vld [vmem:[#allocation5 + $0xe8] sm:$0xff]  ;;  %v97_v16 = vld [vmem:[#allocation5 + $0x158] sm:$0xff] }
  0x10   :  { %255 = vmatpush.msra.mxu3 %v116_v7  ;;  %v66_v12 = vld [vmem:[#allocation5 + $0x60] sm:$0xff]  ;;  %236 = vmatpush.msra.mxu2 %v99_v6  ;;  %v65_v17 = vld [vmem:[#allocation5 + $0x58] sm:$0xff]  ;;  %v96_v20 = vld [vmem:[#allocation5 + $0x150] sm:$0xff] }
  0x11   :  { %215 = vmatpush.msra.mxu1 %v84_v9  ;;  %196 = vmatpush.msra.mxu0 %v67_v8  ;;  %v114_v14 = vld [vmem:[#allocation5 + $0x1e0] sm:$0xff]  ;;  %v113_v18 = vld [vmem:[#allocation5 + $0x1d8] sm:$0xff]  ;;  %v64_v21 = vld [vmem:[#allocation5 + $0x50] sm:$0xff] }
  0x12   :  { %v82_v15 = vld [vmem:[#allocation5 + $0xe0] sm:$0xff]  ;;  %256 = vmatpush.msra.mxu3 %v115_v10  ;;  %237 = vmatpush.msra.mxu2 %v98_v11  ;;  %v81_v19 = vld [vmem:[#allocation5 + $0xd8] sm:$0xff]  ;;  %v112_v22 = vld [vmem:[#allocation5 + $0x1d0] sm:$0xff] }
  0x13   :  { %216 = vmatpush.msra.mxu1 %v83_v13  ;;  %197 = vmatpush.msra.mxu0 %v66_v12  ;;  %v80_v23 = vld [vmem:[#allocation5 + $0xd0] sm:$0xff]  ;;  %v95_v24 = vld [vmem:[#allocation5 + $0x148] sm:$0xff]  ;;  %v94_v28 = vld [vmem:[#allocation5 + $0x140] sm:$0xff] }
  0x14   :  { %257 = vmatpush.msra.mxu3 %v114_v14  ;;  %238 = vmatpush.msra.mxu2 %v97_v16  ;;  %v63_v25 = vld [vmem:[#allocation5 + $0x48] sm:$0xff]  ;;  %v62_v29 = vld [vmem:[#allocation5 + $0x40] sm:$0xff]  ;;  %v93_v32 = vld [vmem:[#allocation5 + $0x138] sm:$0xff] }
  0x15   :  { %217 = vmatpush.msra.mxu1 %v82_v15  ;;  %198 = vmatpush.msra.mxu0 %v65_v17  ;;  %v111_v26 = vld [vmem:[#allocation5 + $0x1c8] sm:$0xff]  ;;  %v110_v30 = vld [vmem:[#allocation5 + $0x1c0] sm:$0xff]  ;;  %v61_v33 = vld [vmem:[#allocation5 + $0x38] sm:$0xff] }
  0x16   :  { %258 = vmatpush.msra.mxu3 %v113_v18  ;;  %239 = vmatpush.msra.mxu2 %v96_v20  ;;  %v79_v27 = vld [vmem:[#allocation5 + $0xc8] sm:$0xff]  ;;  %v78_v31 = vld [vmem:[#allocation5 + $0xc0] sm:$0xff]  ;;  %v109_v34 = vld [vmem:[#allocation5 + $0x1b8] sm:$0xff] }
  0x17   :  { %218 = vmatpush.msra.mxu1 %v81_v19  ;;  %199 = vmatpush.msra.mxu0 %v64_v21  ;;  %v77_v35 = vld [vmem:[#allocation5 + $0xb8] sm:$0xff]  ;;  %v92_v36 = vld [vmem:[#allocation5 + $0x130] sm:$0xff]  ;;  %v91_v40 = vld [vmem:[#allocation5 + $0x128] sm:$0xff] }
  0x18   :  { %259 = vmatpush.msra.mxu3 %v112_v22  ;;  %240 = vmatpush.msra.mxu2 %v95_v24  ;;  %v60_v37 = vld [vmem:[#allocation5 + $0x30] sm:$0xff]  ;;  %v59_v41 = vld [vmem:[#allocation5 + $0x28] sm:$0xff]  ;;  %v90_v44 = vld [vmem:[#allocation5 + $0x120] sm:$0xff] }
  0x19   :  { %219 = vmatpush.msra.mxu1 %v80_v23  ;;  %200 = vmatpush.msra.mxu0 %v63_v25  ;;  %v108_v38 = vld [vmem:[#allocation5 + $0x1b0] sm:$0xff]  ;;  %v107_v42 = vld [vmem:[#allocation5 + $0x1a8] sm:$0xff]  ;;  %v58_v45 = vld [vmem:[#allocation5 + $0x20] sm:$0xff] }
  0x1a   :  { %260 = vmatpush.msra.mxu3 %v111_v26  ;;  %241 = vmatpush.msra.mxu2 %v94_v28  ;;  %v76_v39 = vld [vmem:[#allocation5 + $0xb0] sm:$0xff]  ;;  %v75_v43 = vld [vmem:[#allocation5 + $0xa8] sm:$0xff]  ;;  %v106_v46 = vld [vmem:[#allocation5 + $0x1a0] sm:$0xff] }
  0x1b   :  { %220 = vmatpush.msra.mxu1 %v79_v27  ;;  %201 = vmatpush.msra.mxu0 %v62_v29  ;;  %v74_v47 = vld [vmem:[#allocation5 + $0xa0] sm:$0xff]  ;;  %v89_v48 = vld [vmem:[#allocation5 + $0x118] sm:$0xff]  ;;  %v88_v52 = vld [vmem:[#allocation5 + $0x110] sm:$0xff] }
  0x1c   :  { %261 = vmatpush.msra.mxu3 %v110_v30  ;;  %242 = vmatpush.msra.mxu2 %v93_v32  ;;  %v57_v49 = vld [vmem:[#allocation5 + $0x18] sm:$0xff]  ;;  %v56_v53 = vld [vmem:[#allocation5 + $0x10] sm:$0xff]  ;;  %v87_v56 = vld [vmem:[#allocation5 + $0x108] sm:$0xff] }
  0x1d   :  { %221 = vmatpush.msra.mxu1 %v78_v31  ;;  %202 = vmatpush.msra.mxu0 %v61_v33  ;;  %v105_v50 = vld [vmem:[#allocation5 + $0x198] sm:$0xff]  ;;  %v104_v54 = vld [vmem:[#allocation5 + $0x190] sm:$0xff]  ;;  %v55_v57 = vld [vmem:[#allocation5 + $0x8] sm:$0xff] }
  0x1e   :  { %262 = vmatpush.msra.mxu3 %v109_v34  ;;  %243 = vmatpush.msra.mxu2 %v92_v36  ;;  %v73_v51 = vld [vmem:[#allocation5 + $0x98] sm:$0xff]  ;;  %v72_v55 = vld [vmem:[#allocation5 + $0x90] sm:$0xff]  ;;  %v103_v58 = vld [vmem:[#allocation5 + $0x188] sm:$0xff] }
  0x1f   :  { %222 = vmatpush.msra.mxu1 %v77_v35  ;;  %203 = vmatpush.msra.mxu0 %v60_v37  ;;  %v71_v59 = vld [vmem:[#allocation5 + $0x88] sm:$0xff]  ;;  %v86_v60 = vld [vmem:[#allocation5 + $0x100] sm:$0xff]  ;;  %v165_v62 = vld [vmem:[#allocation5 + $0x378] sm:$0xff] }
  0x20   :  { %263 = vmatpush.msra.mxu3 %v108_v38  ;;  %244 = vmatpush.msra.mxu2 %v91_v40  ;;  %v54_v61 = vld [vmem:[#allocation5] sm:$0xff]  ;;  %v133_v0 = vld [vmem:[#allocation5 + $0x278] sm:$0xff]  ;;  %v164_v2 = vld [vmem:[#allocation5 + $0x370] sm:$0xff] }
  0x21   :  { %223 = vmatpush.msra.mxu1 %v76_v39  ;;  %204 = vmatpush.msra.mxu0 %v59_v41  ;;  %v102_v63 = vld [vmem:[#allocation5 + $0x180] sm:$0xff]  ;;  %v181_v1 = vld [vmem:[#allocation5 + $0x3f8] sm:$0xff]  ;;  %v132_v4 = vld [vmem:[#allocation5 + $0x270] sm:$0xff] }
  0x22   :  { %264 = vmatpush.msra.mxu3 %v107_v42  ;;  %245 = vmatpush.msra.mxu2 %v90_v44  ;;  %v70_v3 = vld [vmem:[#allocation5 + $0x80] sm:$0xff]  ;;  %v149_v5 = vld [vmem:[#allocation5 + $0x2f8] sm:$0xff]  ;;  %v163_v6 = vld [vmem:[#allocation5 + $0x368] sm:$0xff] }
  0x23   :  { %224 = vmatpush.msra.mxu1 %v75_v43  ;;  %205 = vmatpush.msra.mxu0 %v58_v45  ;;  %v180_v7 = vld [vmem:[#allocation5 + $0x3f0] sm:$0xff]  ;;  %v131_v8 = vld [vmem:[#allocation5 + $0x268] sm:$0xff]  ;;  %v162_v10 = vld [vmem:[#allocation5 + $0x360] sm:$0xff] }
  0x24   :  { %265 = vmatpush.msra.mxu3 %v106_v46  ;;  %246 = vmatpush.msra.mxu2 %v89_v48  ;;  %v148_v9 = vld [vmem:[#allocation5 + $0x2f0] sm:$0xff]  ;;  %v179_v11 = vld [vmem:[#allocation5 + $0x3e8] sm:$0xff]  ;;  %v130_v12 = vld [vmem:[#allocation5 + $0x260] sm:$0xff] }
  0x25   :  { %225 = vmatpush.msra.mxu1 %v74_v47  ;;  %206 = vmatpush.msra.mxu0 %v57_v49  ;;  %v147_v13 = vld [vmem:[#allocation5 + $0x2e8] sm:$0xff]  ;;  %v161_v14 = vld [vmem:[#allocation5 + $0x358] sm:$0xff]  ;;  %v178_v15 = vld [vmem:[#allocation5 + $0x3e0] sm:$0xff] }
  0x26   :  { %266 = vmatpush.msra.mxu3 %v105_v50  ;;  %247 = vmatpush.msra.mxu2 %v88_v52  ;;  %v129_v16 = vld [vmem:[#allocation5 + $0x258] sm:$0xff]  ;;  %v146_v17 = vld [vmem:[#allocation5 + $0x2e0] sm:$0xff]  ;;  %v160_v18 = vld [vmem:[#allocation5 + $0x350] sm:$0xff] }
  0x27   :  { %226 = vmatpush.msra.mxu1 %v73_v51  ;;  %207 = vmatpush.msra.mxu0 %v56_v53  ;;  %v177_v19 = vld [vmem:[#allocation5 + $0x3d8] sm:$0xff]  ;;  %v128_v20 = vld [vmem:[#allocation5 + $0x250] sm:$0xff]  ;;  %v159_v22 = vld [vmem:[#allocation5 + $0x348] sm:$0xff] }
  0x28   :  { %267 = vmatpush.msra.mxu3 %v104_v54  ;;  %248 = vmatpush.msra.mxu2 %v87_v56  ;;  %v145_v21 = vld [vmem:[#allocation5 + $0x2d8] sm:$0xff]  ;;  %v176_v23 = vld [vmem:[#allocation5 + $0x3d0] sm:$0xff]  ;;  %v127_v24 = vld [vmem:[#allocation5 + $0x248] sm:$0xff] }
  0x29   :  { %227 = vmatpush.msra.mxu1 %v72_v55  ;;  %208 = vmatpush.msra.mxu0 %v55_v57  ;;  %v144_v25 = vld [vmem:[#allocation5 + $0x2d0] sm:$0xff]  ;;  %v158_v26 = vld [vmem:[#allocation5 + $0x340] sm:$0xff]  ;;  %v175_v27 = vld [vmem:[#allocation5 + $0x3c8] sm:$0xff] }
  0x2a   :  { %268 = vmatpush.msra.mxu3 %v103_v58  ;;  %249 = vmatpush.msra.mxu2 %v86_v60  ;;  %v126_v28 = vld [vmem:[#allocation5 + $0x240] sm:$0xff]  ;;  %v143_v29 = vld [vmem:[#allocation5 + $0x2c8] sm:$0xff]  ;;  %v157_v30 = vld [vmem:[#allocation5 + $0x338] sm:$0xff] }
  0x2b   :  { %228 = vmatpush.msra.mxu1 %v71_v59  ;;  %209 = vmatpush.msra.mxu0 %v54_v61  ;;  %v174_v31 = vld [vmem:[#allocation5 + $0x3c0] sm:$0xff]  ;;  %v125_v32 = vld [vmem:[#allocation5 + $0x238] sm:$0xff]  ;;  %v156_v34 = vld [vmem:[#allocation5 + $0x330] sm:$0xff] }
  0x2c   :  { %314 = vmatpush.msrb.mxu2 %v165_v62  ;;  %269 = vmatpush.msra.mxu3 %v102_v63  ;;  %v142_v33 = vld [vmem:[#allocation5 + $0x2c0] sm:$0xff]  ;;  %v173_v35 = vld [vmem:[#allocation5 + $0x3b8] sm:$0xff]  ;;  %v124_v36 = vld [vmem:[#allocation5 + $0x230] sm:$0xff] }
  0x2d   :  { %274 = vmatpush.msrb.mxu0 %v133_v0  ;;  %229 = vmatpush.msra.mxu1 %v70_v3  ;;  %v141_v37 = vld [vmem:[#allocation5 + $0x2b8] sm:$0xff]  ;;  %v155_v38 = vld [vmem:[#allocation5 + $0x328] sm:$0xff]  ;;  %v172_v39 = vld [vmem:[#allocation5 + $0x3b0] sm:$0xff] }
  0x2e   :  { %334 = vmatpush.msrb.mxu3 %v181_v1  ;;  %315 = vmatpush.msrb.mxu2 %v164_v2  ;;  %v123_v40 = vld [vmem:[#allocation5 + $0x228] sm:$0xff]  ;;  %v140_v41 = vld [vmem:[#allocation5 + $0x2b0] sm:$0xff]  ;;  %v154_v42 = vld [vmem:[#allocation5 + $0x320] sm:$0xff] }
  0x2f   :  { %275 = vmatpush.msrb.mxu0 %v132_v4  ;;  %294 = vmatpush.msrb.mxu1 %v149_v5  ;;  %v171_v43 = vld [vmem:[#allocation5 + $0x3a8] sm:$0xff]  ;;  %v122_v45 = vld [vmem:[#allocation5 + $0x220] sm:$0xff]  ;;  %v153_v47 = vld [vmem:[#allocation5 + $0x318] sm:$0xff] }
  0x30   :  { %316 = vmatpush.msrb.mxu2 %v163_v6  ;;  %335 = vmatpush.msrb.mxu3 %v180_v7  ;;  %v47_v44 = vld [vmem:[#allocation2 + $0x10] sm:$0xff]  ;;  %v170_v48 = vld [vmem:[#allocation5 + $0x3a0] sm:$0xff]  ;;  %v45_v49 = vld [vmem:[#allocation2] sm:$0xff] }
  0x31   :  { %276 = vmatpush.msrb.mxu0 %v131_v8  ;;  %295 = vmatpush.msrb.mxu1 %v148_v9  ;;  %v139_v46 = vld [vmem:[#allocation5 + $0x2a8] sm:$0xff]  ;;  %v48_v50 = vld [vmem:[#allocation2 + $0x18] sm:$0xff]  ;;  %v121_v51 = vld [vmem:[#allocation5 + $0x218] sm:$0xff] }
  0x32   :  { %317 = vmatpush.msrb.mxu2 %v162_v10  ;;  %336 = vmatpush.msrb.mxu3 %v179_v11  ;;  %v138_v52 = vld [vmem:[#allocation5 + $0x2a0] sm:$0xff]  ;;  %v152_v53 = vld [vmem:[#allocation5 + $0x310] sm:$0xff]  ;;  %v169_v54 = vld [vmem:[#allocation5 + $0x398] sm:$0xff] }
  0x33   :  { %277 = vmatpush.msrb.mxu0 %v130_v12  ;;  %296 = vmatpush.msrb.mxu1 %v147_v13  ;;  %v46_v55 = vld [vmem:[#allocation2 + $0x8] sm:$0xff]  ;;  %v120_v56 = vld [vmem:[#allocation5 + $0x210] sm:$0xff]  ;;  %v137_v57 = vld [vmem:[#allocation5 + $0x298] sm:$0xff] }
  0x34   :  { %318 = vmatpush.msrb.mxu2 %v161_v14  ;;  %337 = vmatpush.msrb.mxu3 %v178_v15  ;;  %v151_v58 = vld [vmem:[#allocation5 + $0x308] sm:$0xff]  ;;  %v168_v59 = vld [vmem:[#allocation5 + $0x390] sm:$0xff]  ;;  %v150_v62 = vld [vmem:[#allocation5 + $0x300] sm:$0xff] }
  0x35   :  { %278 = vmatpush.msrb.mxu0 %v129_v16  ;;  %297 = vmatpush.msrb.mxu1 %v146_v17  ;;  %v119_v60 = vld [vmem:[#allocation5 + $0x208] sm:$0xff]  ;;  %v136_v61 = vld [vmem:[#allocation5 + $0x290] sm:$0xff]  ;;  %v118_v1 = vld [vmem:[#allocation5 + $0x200] sm:$0xff] }
  0x36   :  { %319 = vmatpush.msrb.mxu2 %v160_v18  ;;  %338 = vmatpush.msrb.mxu3 %v177_v19  ;;  %v167_v63 = vld [vmem:[#allocation5 + $0x388] sm:$0xff]  ;;  %v166_v3 = vld [vmem:[#allocation5 + $0x380] sm:$0xff]  ;;  %v49_v4 = vld [vmem:[#allocation2 + $0x20] sm:$0xff] }
  0x37   :  { %279 = vmatpush.msrb.mxu0 %v128_v20  ;;  %298 = vmatpush.msrb.mxu1 %v145_v21  ;;  %v51_v0 = vld [vmem:[#allocation2 + $0x30] sm:$0xff]  ;;  %v52_v5 = vld [vmem:[#allocation2 + $0x38] sm:$0xff]  ;;  %v185_v6 = vld [vmem:[#allocation5 + $0x418] sm:$0xff] }
  0x38   :  { %320 = vmatpush.msrb.mxu2 %v159_v22  ;;  %339 = vmatpush.msrb.mxu3 %v176_v23  ;;  %v135_v2 = vld [vmem:[#allocation5 + $0x288] sm:$0xff]  ;;  %v134_v7 = vld [vmem:[#allocation5 + $0x280] sm:$0xff]  ;;  %v184_v9 = vld [vmem:[#allocation5 + $0x410] sm:$0xff] }
  0x39   :  { %280 = vmatpush.msrb.mxu0 %v127_v24  ;;  %299 = vmatpush.msrb.mxu1 %v144_v25  ;;  %v50_v8 = vld [vmem:[#allocation2 + $0x28] sm:$0xff]  ;;  %v183_v10 = vld [vmem:[#allocation5 + $0x408] sm:$0xff]  ;;  %v53_v12 = vld [vmem:[#allocation2 + $0x40] sm:$0xff] }
  0x3a   :  { %321 = vmatpush.msrb.mxu2 %v158_v26  ;;  %340 = vmatpush.msrb.mxu3 %v175_v27  ;;  %v182_v11 = vld [vmem:[#allocation5 + $0x400] sm:$0xff]  ;;  %v399_v13 = vld [vmem:[%s517_s2] ss:$0 sm:$0xff]  ;;  %s382_s2 = sshll.u32 %s518_s3, 4  ;;  %s383_s2 = int_to_ptr.hbm [resolvable:$true] %s382_s2 }
  0x3b   :  { %281 = vmatpush.msrb.mxu0 %v126_v28  ;;  %300 = vmatpush.msrb.mxu1 %v143_v29 }
  0x3c   :  { %322 = vmatpush.msrb.mxu2 %v157_v30  ;;  %341 = vmatpush.msrb.mxu3 %v174_v31 }
  0x3d   :  { %282 = vmatpush.msrb.mxu0 %v125_v32  ;;  %301 = vmatpush.msrb.mxu1 %v142_v33 }
  0x3e   :  { %323 = vmatpush.msrb.mxu2 %v156_v34  ;;  %342 = vmatpush.msrb.mxu3 %v173_v35 }
  0x3f   :  { %283 = vmatpush.msrb.mxu0 %v124_v36  ;;  %302 = vmatpush.msrb.mxu1 %v141_v37 }
  0x40   :  { %324 = vmatpush.msrb.mxu2 %v155_v38  ;;  %343 = vmatpush.msrb.mxu3 %v172_v39 }
  0x41   :  { %284 = vmatpush.msrb.mxu0 %v123_v40  ;;  %303 = vmatpush.msrb.mxu1 %v140_v41 }
  0x42   :  { %325 = vmatpush.msrb.mxu2 %v154_v42  ;;  %344 = vmatpush.msrb.mxu3 %v171_v43 }
  0x43   :  { %250 = vmatmul.f32.vlgmr.msra.gmra.mxu2 %v47_v44  ;;  %285 = vmatpush.msrb.mxu0 %v122_v45 }
  0x44   :  { %304 = vmatpush.msrb.mxu1 %v139_v46  ;;  %326 = vmatpush.msrb.mxu2 %v153_v47 }
  0x45   :  { %345 = vmatpush.msrb.mxu3 %v170_v48  ;;  %210 = vmatmul.f32.vlgmr.msra.gmra.mxu0 %v45_v49 }
  0x46   :  { %270 = vmatmul.f32.vlgmr.msra.gmra.mxu3 %v48_v50  ;;  %286 = vmatpush.msrb.mxu0 %v121_v51 }
  0x47   :  { %305 = vmatpush.msrb.mxu1 %v138_v52  ;;  %327 = vmatpush.msrb.mxu2 %v152_v53 }
  0x48   :  { %346 = vmatpush.msrb.mxu3 %v169_v54  ;;  %230 = vmatmul.f32.vlgmr.msra.gmra.mxu1 %v46_v55 }
  0x49   :  { %287 = vmatpush.msrb.mxu0 %v120_v56  ;;  %306 = vmatpush.msrb.mxu1 %v137_v57 }
  0x4a   :  { %328 = vmatpush.msrb.mxu2 %v151_v58  ;;  %347 = vmatpush.msrb.mxu3 %v168_v59 }
  0x4b   :  { %288 = vmatpush.msrb.mxu0 %v119_v60  ;;  %307 = vmatpush.msrb.mxu1 %v136_v61 }
  0x4c   :  { %329 = vmatpush.msrb.mxu2 %v150_v62  ;;  %348 = vmatpush.msrb.mxu3 %v167_v63 }
  0x4d   :  { %330 = vmatmul.f32.vlgmr.msrb.gmra.mxu2 %v51_v0  ;;  %289 = vmatpush.msrb.mxu0 %v118_v1 }
  0x4e   :  { %308 = vmatpush.msrb.mxu1 %v135_v2  ;;  %349 = vmatpush.msrb.mxu3 %v166_v3 }
  0x4f   :  { %290 = vmatmul.f32.vlgmr.msrb.gmra.mxu0 %v49_v4  ;;  %350 = vmatmul.f32.vlgmr.msrb.gmra.mxu3 %v52_v5 }
  0x50   :  { %366 = vmatpush.msra.mxu0 %v185_v6  ;;  %309 = vmatpush.msrb.mxu1 %v134_v7 }
  0x51   :  { %310 = vmatmul.f32.vlgmr.msrb.gmra.mxu1 %v50_v8 }
  0x52   :  { %367 = vmatpush.msra.mxu0 %v184_v9 }
  0x54   :  { %368 = vmatpush.msra.mxu0 %v183_v10 }
  0x56   :  { %369 = vmatpush.msra.mxu0 %v182_v11 }
  0x57   :  { %393 = vmatmul.msk.f32.vlgmr.msra.gmra.mxu0 %vm190_vm0, %v53_v12 }
  0xc2   :  { %v211_v14 = vpop.f32.mrf.mxu0 }
  0xc3   :  { %v212_v15 = vadd.f32 %v399_v13, %v211_v14 }
  0xc5   :  { %v231_v16 = vpop.f32.mrf.mxu1 }
  0xc6   :  { %v232_v17 = vadd.f32 %v231_v16, %v212_v15  ;;  %v251_v18 = vpop.f32.mrf.mxu2 }
  0xc8   :  { %v252_v19 = vadd.f32 %v251_v18, %v232_v17 }
  0xc9   :  { %v271_v20 = vpop.f32.mrf.mxu3 }
  0xca   :  { %v272_v21 = vadd.f32 %v271_v20, %v252_v19 }
  0xcc   :  { %v291_v22 = vpop.f32.mrf.mxu0 }
  0xcd   :  { %v292_v23 = vadd.f32 %v291_v22, %v272_v21 }
  0xce   :  { %v311_v24 = vpop.f32.mrf.mxu1 }
  0xcf   :  { %v312_v25 = vadd.f32 %v311_v24, %v292_v23 }
  0xd0   :  { %v331_v26 = vpop.f32.mrf.mxu2 }
  0xd1   :  { %v332_v27 = vadd.f32 %v331_v26, %v312_v25 }
  0xd2   :  { %v351_v28 = vpop.f32.mrf.mxu3 }
  0xd3   :  { %v352_v29 = vadd.f32 %v351_v28, %v332_v27 }
  0xd4   :  { %v371_v30 = vpop.f32.mrf.mxu0 }
  0xd5   :  { %v372_v31 = vadd.f32 %v371_v30, %v352_v29 }
  0xd7   :  { %374 = vst [vmem:[#allocation7] sm:$0xff] %v372_v31 }
  0xd8   :  { %385 = dma.vmem_to_hbm [thread:$0]  %s381_s25, 128, %s383_s2, [#allocation4]  }
  0xd9   :  { %476 = dma.done.wait [#allocation4], 128  }
  0xda   :  { %477 = vsyncadd [#allocation4], 4294967168 }
  0xdb   :  { %390 = vsyncpa [#allocation3], 1 }
  0xdc   :  { %391 = vsyncpa [#allocation6], 1 }
  0xdd   :  { %392 = vsyncpa [#allocation4], 1 }

</bundles_post_ra>
